<compile_context>
chip_gen: v7x
topology: tpu7x:2x2x1
jax: 0.10.0
libtpu: 0.0.40
codegen_flags: <defaults>
</compile_context>

<pallas_src>
import functools
import numpy as np
import jax
import jax.numpy as jnp
from jax import lax
from jax.experimental import pallas as pl
from jax.experimental.pallas import tpu as pltpu

_LANE = 128
_INV_SQRT2 = 0.7071067811865476


def _round_up(n, m):
    return ((n + m - 1) // m) * m


def _cdiv(a, b):
    return -(-a // b)


def _gelu_exact(x):
    # exact GELU: 0.5 * x * (1 + erf(x / sqrt(2)))  -- matches torch.nn.GELU()
    return 0.5 * x * (1.0 + lax.erf(x * _INV_SQRT2))


def _gelu_tanh(x):
    # tanh-approx GELU: transcendental goes to the EUP slot (VALU relief).
    return jax.nn.gelu(x, approximate=True)


def _tpu_config():
    """Generation-specific (num_tensorcores, vmem_limit_bytes)."""
    kind = ""
    try:
        kind = (jax.devices()[0].device_kind or "").lower()
    except Exception:
        pass
    if "v7" in kind:
        # v7x: 2 TCs / chip, 64 MiB VMEM per TC -> leave real headroom.
        return 2, 48 * 1024 * 1024
    if "v6" in kind or "v5e" in kind or "v5 lite" in kind or "v5litepod" in kind:
        # v5e / v6e: 1 TC, 128 MiB VMEM -> use most of it.
        return 1, 96 * 1024 * 1024
    # Unknown / older parts: conservative default.
    return 1, 64 * 1024 * 1024


# ----------------------------------------------------------------------------
# Kernel
# ----------------------------------------------------------------------------
def _unetup_kernel(x_ref, skip_ref,
                   w0a_ref, w0b_ref,
                   w1_ref, w2_ref, w3_ref, w4_ref,
                   b_ref, o_ref, *, gelu):
    # Fused concat: cat([x, skip], 1) @ w0  ==  x @ w0[:Cx] + skip @ w0[Cx:]
    h = (jnp.dot(x_ref[...], w0a_ref[...], preferred_element_type=jnp.float32)
         + jnp.dot(skip_ref[...], w0b_ref[...], preferred_element_type=jnp.float32)
         + b_ref[0:1, :])
    # ResidualBlock 1 (is_res=False): GELU(Linear), GELU(Linear)
    h = gelu(jnp.dot(h, w1_ref[...], preferred_element_type=jnp.float32)
             + b_ref[1:2, :])
    h = gelu(jnp.dot(h, w2_ref[...], preferred_element_type=jnp.float32)
             + b_ref[2:3, :])
    # ResidualBlock 2 (is_res=False): GELU(Linear), GELU(Linear)
    h = gelu(jnp.dot(h, w3_ref[...], preferred_element_type=jnp.float32)
             + b_ref[3:4, :])
    h = gelu(jnp.dot(h, w4_ref[...], preferred_element_type=jnp.float32)
             + b_ref[4:5, :])
    o_ref[...] = h.astype(o_ref.dtype)


# ----------------------------------------------------------------------------
# One-time parameter preparation (hoisted out of the per-call forward)
# ----------------------------------------------------------------------------
def prepare_unetup_params(params, cx):
    """Split w0 at the x/skip boundary and zero-pad all feature (N) dims to a
    multiple of 128.  Call ONCE per set of weights and reuse the result."""
    w0 = jnp.asarray(params["w0"], jnp.float32)
    cin, cout = w0.shape
    cs = cin - cx
    cp = _round_up(cout, _LANE)
    pad_n = cp - cout

    w0a = jnp.pad(w0[:cx], ((0, 0), (0, pad_n)))          # (Cx, Cp)
    w0b = jnp.pad(w0[cx:], ((0, 0), (0, pad_n)))          # (Cs, Cp)

    def pad_sq(w):  # (Cout, Cout) -> (Cp, Cp); zero rows/cols keep pad lanes 0
        return jnp.pad(jnp.asarray(w, jnp.float32), ((0, pad_n), (0, pad_n)))

    w1, w2, w3, w4 = (pad_sq(params[k]) for k in ("w1", "w2", "w3", "w4"))

    # Stack the five biases into one (5, Cp) array (fewer inputs / descriptors).
    b_stack = jnp.stack(
        [jnp.pad(jnp.asarray(params[k], jnp.float32).reshape(-1), (0, pad_n))
         for k in ("b0", "b1", "b2", "b3", "b4")],
        axis=0)

    return dict(w0a=w0a, w0b=w0b, w1=w1, w2=w2, w3=w3, w4=w4, b=b_stack,
                cx=cx, cs=cs, cout=cout, cp=cp)


# ----------------------------------------------------------------------------
# Forward wrapper
# ----------------------------------------------------------------------------
def unet_up(x, skip, prepared, *, tile_b=None, approximate_gelu=False):
    """x: (B, Cx), skip: (B, Cs). Returns (B, out_channels)."""
    B, Cx = x.shape
    _, Cs = skip.shape
    assert Cx == prepared["cx"] and Cs == prepared["cs"], "channel mismatch"
    Cout, Cp = prepared["cout"], prepared["cp"]
    dtype = x.dtype

    num_cores, vmem_limit = _tpu_config()
    act_bytes = jnp.dtype(dtype).itemsize
    sub = 8 if act_bytes >= 4 else 16          # bf16 packs 16 rows per vreg

    # Resident weight footprint (f32) and whether to single-buffer it.
    weight_bytes = 4 * (Cx * Cp + Cs * Cp + 4 * Cp * Cp + 5 * Cp)
    single_buffer_w = (2 * weight_bytes) > (vmem_limit // 4)
    wbuf = 1 if single_buffer_w else 2

    # --- batch tiling: as big as VMEM allows (cap 1024), >=2 steps on v7x ---
    if tile_b is None:
        # per-row cost: double-buffered x/skip/out tiles + f32 intermediates.
        per_row = 2 * (Cx + Cs + Cp) * act_bytes + 4 * Cp * 4
        avail = vmem_limit - wbuf * weight_bytes - (2 << 20)   # 2 MiB slack
        cap_rows = max(avail // per_row, sub)
        cap_rows = (cap_rows // sub) * sub
        tile_b = min(1024, cap_rows, _round_up(B, sub))
        if num_cores > 1 and B >= 2 * sub:
            # at least one grid step per TensorCore so "parallel" can shard.
            tile_b = min(tile_b, _round_up(_cdiv(B, num_cores), sub))
    tile_b = max(sub, _round_up(tile_b, sub))

    Bp = _round_up(B, tile_b)
    if Bp != B:
        x = jnp.pad(x, ((0, Bp - B), (0, 0)))
        skip = jnp.pad(skip, ((0, Bp - B), (0, 0)))
    grid = (Bp // tile_b,)

    gelu = _gelu_tanh if approximate_gelu else _gelu_exact
    kernel = functools.partial(_unetup_kernel, gelu=gelu)

    weights = (prepared["w0a"], prepared["w0b"],
               prepared["w1"], prepared["w2"], prepared["w3"], prepared["w4"],
               prepared["b"])

    # Weights never change across grid steps; single-buffer them when large.
    w_kwargs = {"pipeline_mode": pl.Buffered(1)} if single_buffer_w else {}

    def const_spec(arr):
        nd = arr.ndim
        return pl.BlockSpec(arr.shape, lambda i, _nd=nd: (0,) * _nd, **w_kwargs)

    in_specs = [pl.BlockSpec((tile_b, Cx), lambda i: (i, 0)),
                pl.BlockSpec((tile_b, Cs), lambda i: (i, 0))]
    in_specs += [const_spec(w) for w in weights]
    out_spec = pl.BlockSpec((tile_b, Cp), lambda i: (i, 0))

    fn = pl.pallas_call(
        kernel,
        out_shape=jax.ShapeDtypeStruct((Bp, Cp), dtype),
        grid_spec=pl.GridSpec(grid=grid, in_specs=in_specs, out_specs=out_spec),
        compiler_params=pltpu.CompilerParams(
            dimension_semantics=("parallel",),
            vmem_limit_bytes=vmem_limit,
        ),
    )
    out = fn(x, skip, *weights)
    return out[:B, :Cout]


# ----------------------------------------------------------------------------
# Pure-JAX reference + synthetic init
# ----------------------------------------------------------------------------
def unet_up_reference(x, skip, params):
    """Pure-JAX reference of the PyTorch forward (exact-erf GELU)."""
    h = jnp.concatenate([x, skip], axis=1)
    h = h @ params["w0"] + params["b0"]
    h = _gelu_exact(h @ params["w1"] + params["b1"])
    h = _gelu_exact(h @ params["w2"] + params["b2"])
    h = _gelu_exact(h @ params["w3"] + params["b3"])
    h = _gelu_exact(h @ params["w4"] + params["b4"])
    return h


def init_params(key, in_channels, out_channels, dtype=jnp.float32):
    """Deterministic synthetic init (shapes match the PyTorch module)."""
    ks = jax.random.split(key, 10)

    def lin(kw, kb, fan_in, fan_out):
        bound = 1.0 / np.sqrt(fan_in)
        w = jax.random.uniform(kw, (fan_in, fan_out), dtype, -bound, bound)
        b = jax.random.uniform(kb, (1, fan_out), dtype, -bound, bound)
        return w, b

    p = {}
    p["w0"], p["b0"] = lin(ks[0], ks[1], in_channels, out_channels)
    p["w1"], p["b1"] = lin(ks[2], ks[3], out_channels, out_channels)
    p["w2"], p["b2"] = lin(ks[4], ks[5], out_channels, out_channels)
    p["w3"], p["b3"] = lin(ks[6], ks[7], out_channels, out_channels)
    p["w4"], p["b4"] = lin(ks[8], ks[9], out_channels, out_channels)
    return p


if __name__ == "__main__":
    key = jax.random.PRNGKey(0)
    k_x, k_s, k_p = jax.random.split(key, 3)

    B = 16              # batch
    Cx, Cs = 4, 4       # x / skip feature widths
    in_channels = Cx + Cs
    out_channels = 32

    x = jax.random.normal(k_x, (B, Cx), jnp.float32)
    skip = jax.random.normal(k_s, (B, Cs), jnp.float32)
    params = init_params(k_p, in_channels, out_channels)

    # Pad / split weights ONCE (hoisted out of the hot forward path).
    prepared = prepare_unetup_params(params, Cx)

    out = unet_up(x, skip, prepared)
    out = jax.block_until_ready(out)

    ref = unet_up_reference(x, skip, params)
    np.testing.assert_allclose(np.asarray(out), np.asarray(ref),
                               rtol=1e-5, atol=1e-5)
    assert out.shape == (B, out_channels)
    print("KERNEL_OK")
</pallas_src>

<mosaic_0001>
module attributes {stable_mosaic.version = 11 : i64} {
  func.func @_unetup_kernel(%arg0: i32, %arg1: memref<16x4xf32, #tpu.memory_space<vmem>>, %arg2: memref<16x4xf32, #tpu.memory_space<vmem>>, %arg3: memref<4x128xf32, #tpu.memory_space<vmem>>, %arg4: memref<4x128xf32, #tpu.memory_space<vmem>>, %arg5: memref<128x128xf32, #tpu.memory_space<vmem>>, %arg6: memref<128x128xf32, #tpu.memory_space<vmem>>, %arg7: memref<128x128xf32, #tpu.memory_space<vmem>>, %arg8: memref<128x128xf32, #tpu.memory_space<vmem>>, %arg9: memref<5x128xf32, #tpu.memory_space<vmem>>, %arg10: memref<16x128xf32, #tpu.memory_space<vmem>>) attributes {dimension_semantics = [#tpu.dimension_semantics<parallel>], iteration_bounds = array<i64: 1>, scalar_prefetch = 0 : i64, scratch_operands = 0 : i64, tpu.core_type = #tpu.core_type<tc>, window_params = [{transform_indices = @transform_0, window_bounds = array<i64: 16, 4>}, {transform_indices = @transform_1, window_bounds = array<i64: 16, 4>}, {pipeline_mode = #tpu.pipeline_mode<synchronous>, transform_indices = @transform_2, window_bounds = array<i64: 4, 128>}, {pipeline_mode = #tpu.pipeline_mode<synchronous>, transform_indices = @transform_3, window_bounds = array<i64: 4, 128>}, {pipeline_mode = #tpu.pipeline_mode<synchronous>, transform_indices = @transform_4, window_bounds = array<i64: 128, 128>}, {pipeline_mode = #tpu.pipeline_mode<synchronous>, transform_indices = @transform_5, window_bounds = array<i64: 128, 128>}, {pipeline_mode = #tpu.pipeline_mode<synchronous>, transform_indices = @transform_6, window_bounds = array<i64: 128, 128>}, {pipeline_mode = #tpu.pipeline_mode<synchronous>, transform_indices = @transform_7, window_bounds = array<i64: 128, 128>}, {pipeline_mode = #tpu.pipeline_mode<synchronous>, transform_indices = @transform_8, window_bounds = array<i64: 5, 128>}, {transform_indices = @transform_9, window_bounds = array<i64: 16, 128>}]} {
    %c0 = arith.constant 0 : index
    %c0_0 = arith.constant 0 : index
    %0 = vector.load %arg1[%c0, %c0_0] : memref<16x4xf32, #tpu.memory_space<vmem>>, vector<16x4xf32>
    %c0_1 = arith.constant 0 : index
    %c0_2 = arith.constant 0 : index
    %1 = vector.load %arg3[%c0_1, %c0_2] : memref<4x128xf32, #tpu.memory_space<vmem>>, vector<4x128xf32>
    %cst = arith.constant dense<0.000000e+00> : vector<16x128xf32>
    %2 = tpu.matmul %0, %1, %cst {dimension_numbers = #tpu.dot_dimension_numbers<[1], [0], [0], [1], [0, 0, 1, 1], [], []>} : vector<16x4xf32>, vector<4x128xf32>, vector<16x128xf32> -> vector<16x128xf32>
    %c0_3 = arith.constant 0 : index
    %c0_4 = arith.constant 0 : index
    %3 = vector.load %arg2[%c0_3, %c0_4] : memref<16x4xf32, #tpu.memory_space<vmem>>, vector<16x4xf32>
    %c0_5 = arith.constant 0 : index
    %c0_6 = arith.constant 0 : index
    %4 = vector.load %arg4[%c0_5, %c0_6] : memref<4x128xf32, #tpu.memory_space<vmem>>, vector<4x128xf32>
    %cst_7 = arith.constant dense<0.000000e+00> : vector<16x128xf32>
    %5 = tpu.matmul %3, %4, %cst_7 {dimension_numbers = #tpu.dot_dimension_numbers<[1], [0], [0], [1], [0, 0, 1, 1], [], []>} : vector<16x4xf32>, vector<4x128xf32>, vector<16x128xf32> -> vector<16x128xf32>
    %6 = arith.addf %2, %5 : vector<16x128xf32>
    %c0_8 = arith.constant 0 : index
    %c0_9 = arith.constant 0 : index
    %7 = vector.load %arg9[%c0_8, %c0_9] : memref<5x128xf32, #tpu.memory_space<vmem>>, vector<1x128xf32>
    %8 = vector.broadcast %7 : vector<1x128xf32> to vector<16x128xf32>
    %9 = arith.addf %6, %8 : vector<16x128xf32>
    %c0_10 = arith.constant 0 : index
    %c0_11 = arith.constant 0 : index
    %10 = vector.load %arg5[%c0_10, %c0_11] : memref<128x128xf32, #tpu.memory_space<vmem>>, vector<128x128xf32>
    %cst_12 = arith.constant dense<0.000000e+00> : vector<16x128xf32>
    %11 = tpu.matmul %9, %10, %cst_12 {dimension_numbers = #tpu.dot_dimension_numbers<[1], [0], [0], [1], [0, 0, 1, 1], [], []>} : vector<16x128xf32>, vector<128x128xf32>, vector<16x128xf32> -> vector<16x128xf32>
    %c1 = arith.constant 1 : index
    %c0_13 = arith.constant 0 : index
    %12 = vector.load %arg9[%c1, %c0_13] : memref<5x128xf32, #tpu.memory_space<vmem>>, vector<1x128xf32>
    %13 = vector.broadcast %12 : vector<1x128xf32> to vector<16x128xf32>
    %14 = arith.addf %11, %13 : vector<16x128xf32>
    %cst_14 = arith.constant 5.000000e-01 : f32
    %15 = vector.broadcast %cst_14 : f32 to vector<16x128xf32>
    %16 = arith.mulf %15, %14 : vector<16x128xf32>
    %cst_15 = arith.constant 0.707106769 : f32
    %17 = vector.broadcast %cst_15 : f32 to vector<16x128xf32>
    %18 = arith.mulf %14, %17 : vector<16x128xf32>
    %19 = math.erf %18 : vector<16x128xf32>
    %cst_16 = arith.constant 1.000000e+00 : f32
    %20 = vector.broadcast %cst_16 : f32 to vector<16x128xf32>
    %21 = arith.addf %20, %19 : vector<16x128xf32>
    %22 = arith.mulf %16, %21 : vector<16x128xf32>
    %c0_17 = arith.constant 0 : index
    %c0_18 = arith.constant 0 : index
    %23 = vector.load %arg6[%c0_17, %c0_18] : memref<128x128xf32, #tpu.memory_space<vmem>>, vector<128x128xf32>
    %cst_19 = arith.constant dense<0.000000e+00> : vector<16x128xf32>
    %24 = tpu.matmul %22, %23, %cst_19 {dimension_numbers = #tpu.dot_dimension_numbers<[1], [0], [0], [1], [0, 0, 1, 1], [], []>} : vector<16x128xf32>, vector<128x128xf32>, vector<16x128xf32> -> vector<16x128xf32>
    %c2 = arith.constant 2 : index
    %c0_20 = arith.constant 0 : index
    %25 = vector.load %arg9[%c2, %c0_20] : memref<5x128xf32, #tpu.memory_space<vmem>>, vector<1x128xf32>
    %26 = vector.broadcast %25 : vector<1x128xf32> to vector<16x128xf32>
    %27 = arith.addf %24, %26 : vector<16x128xf32>
    %cst_21 = arith.constant 5.000000e-01 : f32
    %28 = vector.broadcast %cst_21 : f32 to vector<16x128xf32>
    %29 = arith.mulf %28, %27 : vector<16x128xf32>
    %cst_22 = arith.constant 0.707106769 : f32
    %30 = vector.broadcast %cst_22 : f32 to vector<16x128xf32>
    %31 = arith.mulf %27, %30 : vector<16x128xf32>
    %32 = math.erf %31 : vector<16x128xf32>
    %cst_23 = arith.constant 1.000000e+00 : f32
    %33 = vector.broadcast %cst_23 : f32 to vector<16x128xf32>
    %34 = arith.addf %33, %32 : vector<16x128xf32>
    %35 = arith.mulf %29, %34 : vector<16x128xf32>
    %c0_24 = arith.constant 0 : index
    %c0_25 = arith.constant 0 : index
    %36 = vector.load %arg7[%c0_24, %c0_25] : memref<128x128xf32, #tpu.memory_space<vmem>>, vector<128x128xf32>
    %cst_26 = arith.constant dense<0.000000e+00> : vector<16x128xf32>
    %37 = tpu.matmul %35, %36, %cst_26 {dimension_numbers = #tpu.dot_dimension_numbers<[1], [0], [0], [1], [0, 0, 1, 1], [], []>} : vector<16x128xf32>, vector<128x128xf32>, vector<16x128xf32> -> vector<16x128xf32>
    %c3 = arith.constant 3 : index
    %c0_27 = arith.constant 0 : index
    %38 = vector.load %arg9[%c3, %c0_27] : memref<5x128xf32, #tpu.memory_space<vmem>>, vector<1x128xf32>
    %39 = vector.broadcast %38 : vector<1x128xf32> to vector<16x128xf32>
    %40 = arith.addf %37, %39 : vector<16x128xf32>
    %cst_28 = arith.constant 5.000000e-01 : f32
    %41 = vector.broadcast %cst_28 : f32 to vector<16x128xf32>
    %42 = arith.mulf %41, %40 : vector<16x128xf32>
    %cst_29 = arith.constant 0.707106769 : f32
    %43 = vector.broadcast %cst_29 : f32 to vector<16x128xf32>
    %44 = arith.mulf %40, %43 : vector<16x128xf32>
    %45 = math.erf %44 : vector<16x128xf32>
    %cst_30 = arith.constant 1.000000e+00 : f32
    %46 = vector.broadcast %cst_30 : f32 to vector<16x128xf32>
    %47 = arith.addf %46, %45 : vector<16x128xf32>
    %48 = arith.mulf %42, %47 : vector<16x128xf32>
    %c0_31 = arith.constant 0 : index
    %c0_32 = arith.constant 0 : index
    %49 = vector.load %arg8[%c0_31, %c0_32] : memref<128x128xf32, #tpu.memory_space<vmem>>, vector<128x128xf32>
    %cst_33 = arith.constant dense<0.000000e+00> : vector<16x128xf32>
    %50 = tpu.matmul %48, %49, %cst_33 {dimension_numbers = #tpu.dot_dimension_numbers<[1], [0], [0], [1], [0, 0, 1, 1], [], []>} : vector<16x128xf32>, vector<128x128xf32>, vector<16x128xf32> -> vector<16x128xf32>
    %c4 = arith.constant 4 : index
    %c0_34 = arith.constant 0 : index
    %51 = vector.load %arg9[%c4, %c0_34] : memref<5x128xf32, #tpu.memory_space<vmem>>, vector<1x128xf32>
    %52 = vector.broadcast %51 : vector<1x128xf32> to vector<16x128xf32>
    %53 = arith.addf %50, %52 : vector<16x128xf32>
    %cst_35 = arith.constant 5.000000e-01 : f32
    %54 = vector.broadcast %cst_35 : f32 to vector<16x128xf32>
    %55 = arith.mulf %54, %53 : vector<16x128xf32>
    %cst_36 = arith.constant 0.707106769 : f32
    %56 = vector.broadcast %cst_36 : f32 to vector<16x128xf32>
    %57 = arith.mulf %53, %56 : vector<16x128xf32>
    %58 = math.erf %57 : vector<16x128xf32>
    %cst_37 = arith.constant 1.000000e+00 : f32
    %59 = vector.broadcast %cst_37 : f32 to vector<16x128xf32>
    %60 = arith.addf %59, %58 : vector<16x128xf32>
    %61 = arith.mulf %55, %60 : vector<16x128xf32>
    %c0_38 = arith.constant 0 : index
    %c0_39 = arith.constant 0 : index
    %62 = vector.load %arg10[%c0_38, %c0_39] : memref<16x128xf32, #tpu.memory_space<vmem>>, vector<16x128xf32>
    tpu.vector_store %arg10[%c0_38, %c0_39], %61 {strides = array<i32>} : memref<16x128xf32, #tpu.memory_space<vmem>>, vector<16x128xf32>,
    return
  }
  func.func @transform_0(%arg0: i32) -> (i32, i32) {
    %c0_i32 = arith.constant 0 : i32
    %c0_i32_0 = arith.constant 0 : i32
    return %arg0, %c0_i32 : i32, i32
  }
  func.func @transform_1(%arg0: i32) -> (i32, i32) {
    %c0_i32 = arith.constant 0 : i32
    %c0_i32_0 = arith.constant 0 : i32
    return %arg0, %c0_i32 : i32, i32
  }
  func.func @transform_2(%arg0: i32) -> (i32, i32) {
    %c0_i32 = arith.constant 0 : i32
    %c0_i32_0 = arith.constant 0 : i32
    %c0_i32_1 = arith.constant 0 : i32
    return %c0_i32, %c0_i32_0 : i32, i32
  }
  func.func @transform_3(%arg0: i32) -> (i32, i32) {
    %c0_i32 = arith.constant 0 : i32
    %c0_i32_0 = arith.constant 0 : i32
    %c0_i32_1 = arith.constant 0 : i32
    return %c0_i32, %c0_i32_0 : i32, i32
  }
  func.func @transform_4(%arg0: i32) -> (i32, i32) {
    %c0_i32 = arith.constant 0 : i32
    %c0_i32_0 = arith.constant 0 : i32
    %c0_i32_1 = arith.constant 0 : i32
    return %c0_i32, %c0_i32_0 : i32, i32
  }
  func.func @transform_5(%arg0: i32) -> (i32, i32) {
    %c0_i32 = arith.constant 0 : i32
    %c0_i32_0 = arith.constant 0 : i32
    %c0_i32_1 = arith.constant 0 : i32
    return %c0_i32, %c0_i32_0 : i32, i32
  }
  func.func @transform_6(%arg0: i32) -> (i32, i32) {
    %c0_i32 = arith.constant 0 : i32
    %c0_i32_0 = arith.constant 0 : i32
    %c0_i32_1 = arith.constant 0 : i32
    return %c0_i32, %c0_i32_0 : i32, i32
  }
  func.func @transform_7(%arg0: i32) -> (i32, i32) {
    %c0_i32 = arith.constant 0 : i32
    %c0_i32_0 = arith.constant 0 : i32
    %c0_i32_1 = arith.constant 0 : i32
    return %c0_i32, %c0_i32_0 : i32, i32
  }
  func.func @transform_8(%arg0: i32) -> (i32, i32) {
    %c0_i32 = arith.constant 0 : i32
    %c0_i32_0 = arith.constant 0 : i32
    %c0_i32_1 = arith.constant 0 : i32
    return %c0_i32, %c0_i32_0 : i32, i32
  }
  func.func @transform_9(%arg0: i32) -> (i32, i32) {
    %c0_i32 = arith.constant 0 : i32
    %c0_i32_0 = arith.constant 0 : i32
    return %arg0, %c0_i32 : i32, i32
  }
}

</mosaic_0001>

<bundles_post_ra>
// kernel: tpu_custom_call.1
= control target key start
LH: loop header
LB: loop body
LE: loop exit
PB: predicated region body
PF: predicated region fallthrough
CT: control target
= control target key end

     0   :  { %14 = vsyncpa [#allocation3], 0  ;;  %s1629_s0 = inlined_call_operand.hbm [shape: f32[16,4], index: 0, kind: input, shape index: {}]   ;;  %s1630_s1 = inlined_call_operand.hbm [shape: f32[16,4], index: 1, kind: input, shape index: {}]   ;;  %s1631_s2 = inlined_call_operand.hbm [shape: f32[4,128], index: 2, kind: input, shape index: {}]   ;;  %s1632_s3 = inlined_call_operand.hbm [shape: f32[4,128], index: 3, kind: input, shape index: {}]   ;;  %s1633_s4 = inlined_call_operand.hbm [shape: f32[128,128], index: 4, kind: input, shape index: {}]   ;;  %s1634_s5 = inlined_call_operand.hbm [shape: f32[128,128], index: 5, kind: input, shape index: {}]   ;;  %s1635_s6 = inlined_call_operand.hbm [shape: f32[128,128], index: 6, kind: input, shape index: {}]   ;;  %s1636_s7 = inlined_call_operand.hbm [shape: f32[128,128], index: 7, kind: input, shape index: {}]   ;;  %s1637_s8 = inlined_call_operand.hbm [shape: f32[5,128], index: 8, kind: input, shape index: {}]   ;;  %s1638_s9 = inlined_call_operand.hbm [shape: f32[16,128], index: 9, kind: output, shape index: {}]  }
   0x1   :  { %15 = vsyncpa [#allocation6], 0 }
   0x2   :  { %16 = vsyncpa [#allocation9], 0 }
   0x3   :  { %17 = vsyncpa [#allocation12], 0 }
   0x4   :  { %18 = vsyncpa [#allocation15], 0 }
   0x5   :  { %19 = vsyncpa [#allocation4], 0  ;;  %s1408_s30 = smov [#allocation5]   ;;  %s1409_s11 = smov [#allocation8]  }
   0x6   :  { %s37_s10 = sshll.u32 %s1408_s30, 4  ;;  %s60_s12 = sshll.u32 %s1409_s11, 4  ;;  %s38_s10 = int_to_ptr.vmem [resolvable:$true] %s37_s10  ;;  %s61_s12 = int_to_ptr.vmem [resolvable:$true] %s60_s12 }
   0x7   :  { %s1176_s15 = scalar_lea.hbm %s1630_s1, 256 }
   0x8   :  { %p1177_p0 = scmp.ne.s32.totalorder %s1630_s1, %s1176_s15  ;;  %p1180_p1 = scmp.lt.u32.totalorder %s1176_s15, %s1630_s1 }
   0xa   :  { %p1182_p2 = pnand %p1180_p1, %p1177_p0 }
   0xc   :  { %1185 = shalt.err (!%p1182_p2)
}
   0xd   :  { %s1186_s20 = scalar_lea.vmem %s38_s10, 256  ;;  %p1191_p4 = scmp.lt.s32.totalorder %s38_s10, %s38_s10 }
   0xe   :  { %p1187_p3 = scmp.ne.s32.totalorder %s38_s10, %s1186_s20  ;;  %p1192_p5 = scmp.lt.s32.totalorder %s1186_s20, %s1186_s20 }
  0x10   :  { %p1193_p6 = por %p1192_p5, %p1191_p4 }
  0x12   :  { %p1194_p7 = pnand %p1193_p6, %p1187_p3 }
  0x14   :  { %1197 = shalt.err (!%p1194_p7)
}
  0x15   :  { %s1410_s21 = smov 128   ;;  %s1411_s22 = smov 8  }
  0x16   :  { %43 = dma.hbm_to_vmem [thread:$0]  %s1630_s1, 256, %s38_s10, [#allocation6], %s1410_s21, %s1410_s21, %s1411_s22  }
  0x17   :  { %s1198_s27 = scalar_lea.hbm %s1632_s3, 64 }
  0x18   :  { %p1199_p8 = scmp.ne.s32.totalorder %s1632_s3, %s1198_s27  ;;  %p1202_p9 = scmp.lt.u32.totalorder %s1198_s27, %s1632_s3 }
  0x1a   :  { %p1204_p10 = pnand %p1202_p9, %p1199_p8 }
  0x1c   :  { %1207 = shalt.err (!%p1204_p10)
}
  0x1d   :  { %s1208_s13 = scalar_lea.vmem %s61_s12, 64  ;;  %p1213_p12 = scmp.lt.s32.totalorder %s61_s12, %s61_s12 }
  0x1e   :  { %p1209_p11 = scmp.ne.s32.totalorder %s61_s12, %s1208_s13  ;;  %p1214_p13 = scmp.lt.s32.totalorder %s1208_s13, %s1208_s13 }
  0x20   :  { %p1215_p0 = por %p1214_p13, %p1213_p12 }
  0x22   :  { %p1216_p1 = pnand %p1215_p0, %p1209_p11 }
  0x24   :  { %1219 = shalt.err (!%p1216_p1)
}
  0x25   :  { %63 = dma.hbm_to_vmem [thread:$0]  %s1632_s3, 64, %s61_s12, [#allocation9]  }
  0x26   :  { %s1412_s14 = smov [#allocation11]   ;;  %s1413_s16 = smov [#allocation14]  }
  0x27   :  { %s81_s15 = sshll.u32 %s1412_s14, 4  ;;  %s105_s17 = sshll.u32 %s1413_s16, 4  ;;  %s82_s15 = int_to_ptr.vmem [resolvable:$true] %s81_s15  ;;  %s1497_s17 = int_to_ptr.vmem [resolvable:$true] %s105_s17 }
  0x28   :  { %s1220_s20 = scalar_lea.hbm %s1634_s5, 2048 }
  0x29   :  { %p1221_p2 = scmp.ne.s32.totalorder %s1634_s5, %s1220_s20  ;;  %p1224_p3 = scmp.lt.u32.totalorder %s1220_s20, %s1634_s5 }
  0x2b   :  { %p1226_p4 = pnand %p1224_p3, %p1221_p2 }
  0x2d   :  { %1229 = shalt.err (!%p1226_p4)
}
  0x2e   :  { %s1230_s3 = scalar_lea.vmem %s82_s15, 2048  ;;  %p1235_p6 = scmp.lt.s32.totalorder %s82_s15, %s82_s15 }
  0x2f   :  { %p1231_p5 = scmp.ne.s32.totalorder %s82_s15, %s1230_s3  ;;  %p1236_p7 = scmp.lt.s32.totalorder %s1230_s3, %s1230_s3 }
  0x31   :  { %p1237_p8 = por %p1236_p7, %p1235_p6 }
  0x33   :  { %p1238_p9 = pnand %p1237_p8, %p1231_p5 }
  0x35   :  { %1241 = shalt.err (!%p1238_p9)
}
  0x36   :  { %87 = dma.hbm_to_vmem [thread:$0]  %s1634_s5, 2048, %s82_s15, [#allocation12], %s1410_s21, %s1410_s21, %s1411_s22  }
  0x37   :  { %s1242_s30 = scalar_lea.hbm %s1636_s7, 2048 }
  0x38   :  { %p1243_p10 = scmp.ne.s32.totalorder %s1636_s7, %s1242_s30  ;;  %p1246_p11 = scmp.lt.u32.totalorder %s1242_s30, %s1636_s7 }
  0x3a   :  { %p1248_p12 = pnand %p1246_p11, %p1243_p10 }
  0x3c   :  { %1251 = shalt.err (!%p1248_p12)
}
  0x3d   :  { %s1252_s14 = scalar_lea.vmem %s1497_s17, 2048  ;;  %p1257_p0 = scmp.lt.s32.totalorder %s1497_s17, %s1497_s17 }
  0x3e   :  { %p1253_p13 = scmp.ne.s32.totalorder %s1497_s17, %s1252_s14  ;;  %p1258_p1 = scmp.lt.s32.totalorder %s1252_s14, %s1252_s14 }
  0x40   :  { %p1259_p2 = por %p1258_p1, %p1257_p0 }
  0x42   :  { %p1260_p3 = pnand %p1259_p2, %p1253_p13 }
  0x44   :  { %1263 = shalt.err (!%p1260_p3)
}
  0x45   :  { %111 = dma.hbm_to_vmem [thread:$0]  %s1636_s7, 2048, %s1497_s17, [#allocation15], %s1410_s21, %s1410_s21, %s1411_s22  }
  0x46   :  { %s1414_s16 = smov [#allocation2]   ;;  %s1415_s19 = smov [#allocation7]  }
  0x47   :  { %s25_s18 = sshll.u32 %s1414_s16, 4  ;;  %s50_s20 = sshll.u32 %s1415_s19, 4  ;;  %s26_s18 = int_to_ptr.vmem [resolvable:$true] %s25_s18  ;;  %s51_s20 = int_to_ptr.vmem [resolvable:$true] %s50_s20 }
  0x48   :  { %s1264_s25 = scalar_lea.hbm %s1629_s0, 256 }
  0x49   :  { %p1265_p4 = scmp.ne.s32.totalorder %s1629_s0, %s1264_s25  ;;  %p1268_p5 = scmp.lt.u32.totalorder %s1264_s25, %s1629_s0 }
  0x4b   :  { %p1270_p6 = pnand %p1268_p5, %p1265_p4 }
  0x4d   :  { %1273 = shalt.err (!%p1270_p6)
}
  0x4e   :  { %s1274_s7 = scalar_lea.vmem %s26_s18, 256  ;;  %p1279_p8 = scmp.lt.s32.totalorder %s26_s18, %s26_s18 }
  0x4f   :  { %p1275_p7 = scmp.ne.s32.totalorder %s26_s18, %s1274_s7  ;;  %p1280_p9 = scmp.lt.s32.totalorder %s1274_s7, %s1274_s7 }
  0x51   :  { %p1281_p10 = por %p1280_p9, %p1279_p8 }
  0x53   :  { %p1282_p11 = pnand %p1281_p10, %p1275_p7 }
  0x55   :  { %1285 = shalt.err (!%p1282_p11)
}
  0x56   :  { %31 = dma.hbm_to_vmem [thread:$0]  %s1629_s0, 256, %s26_s18, [#allocation3], %s1410_s21, %s1410_s21, %s1411_s22  }
  0x57   :  { %s1286_s11 = scalar_lea.hbm %s1631_s2, 64 }
  0x58   :  { %p1287_p12 = scmp.ne.s32.totalorder %s1631_s2, %s1286_s11  ;;  %p1290_p13 = scmp.lt.u32.totalorder %s1286_s11, %s1631_s2 }
  0x5a   :  { %p1292_p0 = pnand %p1290_p13, %p1287_p12 }
  0x5c   :  { %1295 = shalt.err (!%p1292_p0)
}
  0x5d   :  { %s1296_s5 = scalar_lea.vmem %s51_s20, 64  ;;  %p1301_p2 = scmp.lt.s32.totalorder %s51_s20, %s51_s20 }
  0x5e   :  { %p1297_p1 = scmp.ne.s32.totalorder %s51_s20, %s1296_s5  ;;  %p1302_p3 = scmp.lt.s32.totalorder %s1296_s5, %s1296_s5 }
  0x60   :  { %p1303_p4 = por %p1302_p3, %p1301_p2 }
  0x62   :  { %p1304_p5 = pnand %p1303_p4, %p1297_p1 }
  0x64   :  { %1307 = shalt.err (!%p1304_p5)
}
  0x65   :  { %53 = dma.hbm_to_vmem [thread:$0]  %s1631_s2, 64, %s51_s20, [#allocation6]  }
  0x66   :  { %s1416_s16 = smov [#allocation10]   ;;  %s1417_s19 = smov [#allocation13]  }
  0x67   :  { %s69_s18 = sshll.u32 %s1416_s16, 4  ;;  %s93_s23 = sshll.u32 %s1417_s19, 4  ;;  %s70_s18 = int_to_ptr.vmem [resolvable:$true] %s69_s18  ;;  %s1561_s23 = int_to_ptr.vmem [resolvable:$true] %s93_s23 }
  0x68   :  { %s1308_s26 = scalar_lea.hbm %s1633_s4, 2048 }
  0x69   :  { %p1309_p6 = scmp.ne.s32.totalorder %s1633_s4, %s1308_s26  ;;  %p1312_p7 = scmp.lt.u32.totalorder %s1308_s26, %s1633_s4 }
  0x6b   :  { %p1314_p8 = pnand %p1312_p7, %p1309_p6 }
  0x6d   :  { %1317 = shalt.err (!%p1314_p8)
}
  0x6e   :  { %s1318_s2 = scalar_lea.vmem %s70_s18, 2048  ;;  %p1323_p10 = scmp.lt.s32.totalorder %s70_s18, %s70_s18 }
  0x6f   :  { %p1319_p9 = scmp.ne.s32.totalorder %s70_s18, %s1318_s2  ;;  %p1324_p11 = scmp.lt.s32.totalorder %s1318_s2, %s1318_s2 }
  0x71   :  { %p1325_p12 = por %p1324_p11, %p1323_p10 }
  0x73   :  { %p1326_p13 = pnand %p1325_p12, %p1319_p9 }
  0x75   :  { %1329 = shalt.err (!%p1326_p13)
}
  0x76   :  { %75 = dma.hbm_to_vmem [thread:$0]  %s1633_s4, 2048, %s70_s18, [#allocation9], %s1410_s21, %s1410_s21, %s1411_s22  }
  0x77   :  { %s1330_s30 = scalar_lea.hbm %s1635_s6, 2048 }
  0x78   :  { %p1331_p0 = scmp.ne.s32.totalorder %s1635_s6, %s1330_s30  ;;  %p1334_p1 = scmp.lt.u32.totalorder %s1330_s30, %s1635_s6 }
  0x7a   :  { %p1336_p2 = pnand %p1334_p1, %p1331_p0 }
  0x7c   :  { %1339 = shalt.err (!%p1336_p2)
}
  0x7d   :  { %s1340_s14 = scalar_lea.vmem %s1561_s23, 2048  ;;  %p1345_p4 = scmp.lt.s32.totalorder %s1561_s23, %s1561_s23 }
  0x7e   :  { %p1341_p3 = scmp.ne.s32.totalorder %s1561_s23, %s1340_s14  ;;  %p1346_p5 = scmp.lt.s32.totalorder %s1340_s14, %s1340_s14 }
  0x80   :  { %p1347_p6 = por %p1346_p5, %p1345_p4 }
  0x82   :  { %p1348_p7 = pnand %p1347_p6, %p1341_p3 }
  0x84   :  { %1351 = shalt.err (!%p1348_p7)
}
  0x85   :  { %99 = dma.hbm_to_vmem [thread:$0]  %s1635_s6, 2048, %s1561_s23, [#allocation12], %s1410_s21, %s1410_s21, %s1411_s22  }
  0x86   :  { %s1418_s0 = smov [#allocation16]   ;;  %s1352_s19 = scalar_lea.hbm %s1637_s8, 128 }
  0x87   :  { %s118_s15 = sshll.u32 %s1418_s0, 4  ;;  %p1353_p8 = scmp.ne.s32.totalorder %s1637_s8, %s1352_s19  ;;  %s119_s15 = int_to_ptr.vmem [resolvable:$true] %s118_s15 }
  0x88   :  { %p1356_p9 = scmp.lt.u32.totalorder %s1352_s19, %s1637_s8 }
  0x8a   :  { %p1358_p10 = pnand %p1356_p9, %p1353_p8 }
  0x8c   :  { %1361 = shalt.err (!%p1358_p10)
}
  0x8d   :  { %s1362_s12 = scalar_lea.vmem %s119_s15, 128  ;;  %p1367_p12 = scmp.lt.s32.totalorder %s119_s15, %s119_s15 }
  0x8e   :  { %p1363_p11 = scmp.ne.s32.totalorder %s119_s15, %s1362_s12  ;;  %p1368_p13 = scmp.lt.s32.totalorder %s1362_s12, %s1362_s12 }
  0x90   :  { %p1369_p0 = por %p1368_p13, %p1367_p12 }
  0x92   :  { %p1370_p1 = pnand %p1369_p0, %p1363_p11 }
  0x94   :  { %1373 = shalt.err (!%p1370_p1)
}
  0x95   :  { %121 = dma.hbm_to_vmem [thread:$0]  %s1637_s8, 128, %s119_s15, [#allocation15]  }
  0x96   :  { %1396 = dma.done.wait [#allocation3], 256  }
  0x97   :  { %1397 = vsyncadd [#allocation3], 4294967040 }
  0x98   :  { %1398 = dma.done.wait [#allocation6], 320  }
  0x99   :  { %1399 = vsyncadd [#allocation6], 4294966976 }
  0x9a   :  { %1400 = dma.done.wait [#allocation9], 2112  }
  0x9b   :  { %1401 = vsyncadd [#allocation9], 4294965184 }
  0x9c   :  { %1402 = dma.done.wait [#allocation12], 4096  }
  0x9d   :  { %1403 = vsyncadd [#allocation12], 4294963200 }
  0x9e   :  { %1404 = dma.done.wait [#allocation15], 2176  }
  0x9f   :  { %1405 = vsyncadd [#allocation15], 4294965120  ;;  %vm162_vm0 = vcmask 1043456   ;;  %vm155_vm1 = vcmask 31744   ;;  %v154_v0 = vld [vmem:[#allocation8] sm:$0xf] }
  0xa0   :  { %v151_v1 = vld [vmem:[#allocation7] sm:$0xf]  ;;  %v152_v2 = vld [vmem:[#allocation5] sm:$0xff]  ;;  %868 = vmatprep.subr.msk.mxu1 %vm162_vm0, %v154_v0  ;;  %v153_v4 = vld [vmem:[#allocation5 + $0x8] sm:$0xff]  ;;  %s1419_s8 = smov [#allocation17]  }
  0xa1   :  { %873 = vmatprep.subr.msk.mxu0 %vm162_vm0, %v151_v1  ;;  %v149_v3 = vld [vmem:[#allocation2] sm:$0xff]  ;;  %v150_v5 = vld [vmem:[#allocation2 + $0x8] sm:$0xff]  ;;  %869 = vmatpush3.msk.msra.mxu1 %vm162_vm0, %v154_v0  ;;  %v333_v7 = vld [vmem:[#allocation10 + $0x8] sm:$0xff]  ;;  %s763_s27 = sshll.u32 %s1419_s8, 4  ;;  %s764_s27 = int_to_ptr.vmem [resolvable:$true] %s763_s27 }
  0xa2   :  { %870 = vmatprep.mubr.msk.f32.mxu1 %vm155_vm1, %v152_v2  ;;  %v332_v6 = vld [vmem:[#allocation10] sm:$0xff]  ;;  %v334_v8 = vld [vmem:[#allocation10 + $0x10] sm:$0xff]  ;;  %874 = vmatpush3.msk.msra.mxu0 %vm162_vm0, %v151_v1  ;;  %v335_v10 = vld [vmem:[#allocation10 + $0x18] sm:$0xff]  ;;  %s1374_s7 = scalar_lea.vmem %s764_s27, 256  ;;  %p1379_p3 = scmp.lt.s32.totalorder %s764_s27, %s764_s27 }
  0xa3   :  { %875 = vmatprep.mubr.msk.f32.mxu0 %vm155_vm1, %v149_v3  ;;  %v1018_v9 = vpack.c.bf16 %v333_v7, %v332_v6  ;;  %871 = vmatmul.mubr.msk.f32.vlgmr.msra.gmra.mrb[0].mxu1 %vm155_vm1, %v153_v4  ;;  %v1022_v11 = vpack.c.bf16 %v335_v10, %v334_v8  ;;  %v336_v12 = vld [vmem:[#allocation10 + $0x20] sm:$0xff]  ;;  %v337_v13 = vld [vmem:[#allocation10 + $0x28] sm:$0xff]  ;;  %v338_v15 = vld [vmem:[#allocation10 + $0x30] sm:$0xff]  ;;  %p1375_p2 = scmp.ne.s32.totalorder %s764_s27, %s1374_s7  ;;  %p1380_p4 = scmp.lt.s32.totalorder %s1374_s7, %s1374_s7 }
  0xa4   :  { %876 = vmatmul.mubr.msk.f32.vlgmr.msra.gmra.mrb[0].mxu0 %vm155_vm1, %v150_v5  ;;  %v1026_v14 = vpack.c.bf16 %v337_v13, %v336_v12  ;;  %v339_v16 = vld [vmem:[#allocation10 + $0x38] sm:$0xff]  ;;  %v340_v18 = vld [vmem:[#allocation10 + $0x40] sm:$0xff]  ;;  %v341_v19 = vld [vmem:[#allocation10 + $0x48] sm:$0xff] }
  0xa5   :  { %1019 = vmatprep.subr.bf16.mxu1 %v1018_v9  ;;  %v1030_v17 = vpack.c.bf16 %v339_v16, %v338_v15  ;;  %v1034_v20 = vpack.c.bf16 %v341_v19, %v340_v18  ;;  %v342_v21 = vld [vmem:[#allocation10 + $0x50] sm:$0xff]  ;;  %v343_v22 = vld [vmem:[#allocation10 + $0x58] sm:$0xff]  ;;  %v344_v24 = vld [vmem:[#allocation10 + $0x60] sm:$0xff]  ;;  %p1381_p5 = por %p1380_p4, %p1379_p3 }
  0xa6   :  { %1021 = vmatpush3.bf16.msra.mxu1 %v1018_v9  ;;  %v1038_v23 = vpack.c.bf16 %v343_v22, %v342_v21  ;;  %v345_v25 = vld [vmem:[#allocation10 + $0x68] sm:$0xff]  ;;  %v346_v27 = vld [vmem:[#allocation10 + $0x70] sm:$0xff]  ;;  %v347_v28 = vld [vmem:[#allocation10 + $0x78] sm:$0xff] }
  0xa7   :  { %1023 = vmatprep.subr.bf16.mxu1 %v1022_v11  ;;  %v1042_v26 = vpack.c.bf16 %v345_v25, %v344_v24  ;;  %v1046_v29 = vpack.c.bf16 %v347_v28, %v346_v27  ;;  %v438_v30 = vld [vmem:[#allocation11] sm:$0xff]  ;;  %v439_v31 = vld [vmem:[#allocation11 + $0x8] sm:$0xff]  ;;  %v440_v32 = vld [vmem:[#allocation11 + $0x10] sm:$0xff]  ;;  %p1382_p6 = pnand %p1381_p5, %p1375_p2 }
  0xa8   :  { %v1050_v33 = vpack.c.bf16 %v439_v31, %v438_v30  ;;  %v441_v34 = vld [vmem:[#allocation11 + $0x18] sm:$0xff]  ;;  %v442_v36 = vld [vmem:[#allocation11 + $0x20] sm:$0xff]  ;;  %v443_v37 = vld [vmem:[#allocation11 + $0x28] sm:$0xff] }
  0xa9   :  { %v1054_v35 = vpack.c.bf16 %v441_v34, %v440_v32  ;;  %v1058_v38 = vpack.c.bf16 %v443_v37, %v442_v36  ;;  %v785_v42 = vld [vmem:[#allocation16] ss:$0 sm:$0xff]  ;;  %v444_v48 = vld [vmem:[#allocation11 + $0x30] sm:$0xff]  ;;  %v445_v49 = vld [vmem:[#allocation11 + $0x38] sm:$0xff] }
  0xaa   :  { %1025 = vmatpush3.bf16.msra.mxu1 %v1022_v11  ;;  %1051 = vmatprep.subr.bf16.mxu0 %v1050_v33  ;;  %v1062_v50 = vpack.c.bf16 %v445_v49, %v444_v48  ;;  %v446_v51 = vld [vmem:[#allocation11 + $0x40] sm:$0xff]  ;;  %v447_v52 = vld [vmem:[#allocation11 + $0x48] sm:$0xff]  ;;  %v448_v54 = vld [vmem:[#allocation11 + $0x50] sm:$0xff] }
  0xab   :  { %1027 = vmatprep.subr.bf16.mxu1 %v1026_v14  ;;  %1053 = vmatpush3.bf16.msra.mxu0 %v1050_v33  ;;  %v1066_v53 = vpack.c.bf16 %v447_v52, %v446_v51  ;;  %v449_v55 = vld [vmem:[#allocation11 + $0x58] sm:$0xff]  ;;  %v450_v57 = vld [vmem:[#allocation11 + $0x60] sm:$0xff]  ;;  %v451_v58 = vld [vmem:[#allocation11 + $0x68] sm:$0xff] }
  0xac   :  { %1055 = vmatprep.subr.bf16.mxu0 %v1054_v35  ;;  %v1070_v56 = vpack.c.bf16 %v449_v55, %v448_v54  ;;  %v1074_v59 = vpack.c.bf16 %v451_v58, %v450_v57  ;;  %v452_v60 = vld [vmem:[#allocation11 + $0x70] sm:$0xff]  ;;  %v453_v61 = vld [vmem:[#allocation11 + $0x78] sm:$0xff]  ;;  %v544_v63 = vld [vmem:[#allocation13] sm:$0xff] }
  0xad   :  { %v1078_v62 = vpack.c.bf16 %v453_v61, %v452_v60  ;;  %v545_v0 = vld [vmem:[#allocation13 + $0x8] sm:$0xff]  ;;  %v546_v1 = vld [vmem:[#allocation13 + $0x10] sm:$0xff]  ;;  %v547_v3 = vld [vmem:[#allocation13 + $0x18] sm:$0xff] }
  0xae   :  { %1029 = vmatpush3.bf16.msra.mxu1 %v1026_v14  ;;  %v1082_v2 = vpack.c.bf16 %v545_v0, %v544_v63  ;;  %v1086_v4 = vpack.c.bf16 %v547_v3, %v546_v1  ;;  %v548_v5 = vld [vmem:[#allocation13 + $0x20] sm:$0xff]  ;;  %v549_v6 = vld [vmem:[#allocation13 + $0x28] sm:$0xff]  ;;  %v551_v24 = vld [vmem:[#allocation13 + $0x38] sm:$0xff] }
  0xaf   :  { %1031 = vmatprep.subr.bf16.mxu1 %v1030_v17  ;;  %1057 = vmatpush3.bf16.msra.mxu0 %v1054_v35  ;;  %v1090_v7 = vpack.c.bf16 %v549_v6, %v548_v5  ;;  %v786_v8 = vld [vmem:[#allocation16 + $0x1] ss:$0 sm:$0xff]  ;;  %v553_v27 = vld [vmem:[#allocation13 + $0x48] sm:$0xff]  ;;  %v555_v30 = vld [vmem:[#allocation13 + $0x58] sm:$0xff] }
  0xb0   :  { %1059 = vmatprep.subr.bf16.mxu0 %v1058_v38  ;;  %v556_v32 = vld [vmem:[#allocation13 + $0x60] sm:$0xff]  ;;  %v557_v33 = vld [vmem:[#allocation13 + $0x68] sm:$0xff]  ;;  %v558_v35 = vld [vmem:[#allocation13 + $0x70] sm:$0xff] }
  0xb1   :  { %v1106_v34 = vpack.c.bf16 %v557_v33, %v556_v32  ;;  %v559_v36 = vld [vmem:[#allocation13 + $0x78] sm:$0xff]  ;;  %v658_v1 = vld [vmem:[#allocation14 + $0x40] sm:$0xff] }
  0xb2   :  { %1033 = vmatpush3.bf16.msra.mxu1 %v1030_v17  ;;  %v1110_v37 = vpack.c.bf16 %v559_v36, %v558_v35  ;;  %v657_v63 = vld [vmem:[#allocation14 + $0x38] sm:$0xff] }
  0xb3   :  { %1035 = vmatprep.subr.bf16.mxu1 %v1034_v20  ;;  %1061 = vmatpush3.bf16.msra.mxu0 %v1058_v38  ;;  %v650_v38 = vld [vmem:[#allocation14] sm:$0xff]  ;;  %v661_v5 = vld [vmem:[#allocation14 + $0x58] sm:$0xff] }
  0xb4   :  { %1063 = vmatprep.subr.bf16.mxu0 %v1062_v50 }
  0xb6   :  { %1037 = vmatpush3.bf16.msra.mxu1 %v1034_v20 }
  0xb7   :  { %1039 = vmatprep.subr.bf16.mxu1 %v1038_v23  ;;  %1065 = vmatpush3.bf16.msra.mxu0 %v1062_v50 }
  0xb8   :  { %1067 = vmatprep.subr.bf16.mxu0 %v1066_v53 }
  0xba   :  { %1041 = vmatpush3.bf16.msra.mxu1 %v1038_v23  ;;  %v550_v23 = vld [vmem:[#allocation13 + $0x30] sm:$0xff] }
  0xbb   :  { %1043 = vmatprep.subr.bf16.mxu1 %v1042_v26  ;;  %1069 = vmatpush3.bf16.msra.mxu0 %v1066_v53  ;;  %v1094_v25 = vpack.c.bf16 %v551_v24, %v550_v23 }
  0xbc   :  { %1071 = vmatprep.subr.bf16.mxu0 %v1070_v56 }
  0xbe   :  { %1045 = vmatpush3.bf16.msra.mxu1 %v1042_v26  ;;  %v552_v26 = vld [vmem:[#allocation13 + $0x40] sm:$0xff] }
  0xbf   :  { %1047 = vmatprep.subr.bf16.mxu1 %v1046_v29  ;;  %1073 = vmatpush3.bf16.msra.mxu0 %v1070_v56  ;;  %v1098_v28 = vpack.c.bf16 %v553_v27, %v552_v26 }
  0xc0   :  { %1075 = vmatprep.subr.bf16.mxu0 %v1074_v59 }
  0xc2   :  { %1049 = vmatpush3.bf16.msra.mxu1 %v1046_v29  ;;  %v554_v29 = vld [vmem:[#allocation13 + $0x50] sm:$0xff] }
  0xc3   :  { %1077 = vmatpush3.bf16.msra.mxu0 %v1074_v59  ;;  %1083 = vmatprep.subr.bf16.mxu1 %v1082_v2  ;;  %v1102_v31 = vpack.c.bf16 %v555_v30, %v554_v29 }
  0xc4   :  { %1079 = vmatprep.subr.bf16.mxu0 %v1078_v62 }
  0xc7   :  { %1081 = vmatpush3.bf16.msra.mxu0 %v1078_v62  ;;  %v656_v62 = vld [vmem:[#allocation14 + $0x30] sm:$0xff] }
  0xc8   :  { %v1126_v0 = vpack.c.bf16 %v657_v63, %v656_v62 }
 0x176   :  { %v872_v39 = vpop.f32.mrb[0].mxu1 }
 0x177   :  { %v877_v40 = vpop.f32.mrb[0].mxu0  ;;  %v232_v43 = vpop.f32.mrb[1].mxu1 }
 0x178   :  { %v322_v41 = vadd.f32 %v877_v40, %v872_v39  ;;  %v316_v44 = vpop.f32.mrb[1].mxu0  ;;  %v651_v39 = vld [vmem:[#allocation14 + $0x8] sm:$0xff]  ;;  %v652_v40 = vld [vmem:[#allocation14 + $0x10] sm:$0xff] }
 0x179   :  { %v317_v45 = vadd.f32 %v316_v44, %v232_v43  ;;  %v654_v44 = vld [vmem:[#allocation14 + $0x20] sm:$0xff] }
 0x17a   :  { %v331_v47 = vadd.f32 %v785_v42, %v322_v41  ;;  %v1114_v41 = vpack.c.bf16 %v651_v39, %v650_v38 }
 0x17b   :  { %v330_v46 = vadd.f32 %v785_v42, %v317_v45  ;;  %v653_v42 = vld [vmem:[#allocation14 + $0x18] sm:$0xff]  ;;  %v655_v45 = vld [vmem:[#allocation14 + $0x28] sm:$0xff] }
 0x17c   :  { %v1118_v43 = vpack.c.bf16 %v653_v42, %v652_v40  ;;  %1115 = vmatprep.subr.bf16.mxu0 %v1114_v41 }
 0x17d   :  { %910 = vmatprep.mubr.f32.mxu1 %v330_v46  ;;  %v1122_v46 = vpack.c.bf16 %v655_v45, %v654_v44 }
 0x17e   :  { %911 = vmatmul.mubr.f32.vlgmr.msra.gmra.mrb[2].mxu1 %v331_v47  ;;  %v787_v47 = vld [vmem:[#allocation16 + $0x2] ss:$0 sm:$0xff] }
 0x17f   :  { %1085 = vmatpush3.bf16.msra.mxu1 %v1082_v2  ;;  %v659_v2 = vld [vmem:[#allocation14 + $0x48] sm:$0xff] }
 0x180   :  { %1087 = vmatprep.subr.bf16.mxu1 %v1086_v4  ;;  %v1130_v3 = vpack.c.bf16 %v659_v2, %v658_v1 }
 0x183   :  { %1089 = vmatpush3.bf16.msra.mxu1 %v1086_v4  ;;  %v660_v4 = vld [vmem:[#allocation14 + $0x50] sm:$0xff] }
 0x184   :  { %1091 = vmatprep.subr.bf16.mxu1 %v1090_v7  ;;  %v1134_v6 = vpack.c.bf16 %v661_v5, %v660_v4 }
 0x187   :  { %1093 = vmatpush3.bf16.msra.mxu1 %v1090_v7  ;;  %v662_v7 = vld [vmem:[#allocation14 + $0x60] sm:$0xff] }
 0x188   :  { %1095 = vmatprep.subr.bf16.mxu1 %v1094_v25 }
 0x18b   :  { %1097 = vmatpush3.bf16.msra.mxu1 %v1094_v25 }
 0x18c   :  { %1099 = vmatprep.subr.bf16.mxu1 %v1098_v28 }
 0x18f   :  { %1101 = vmatpush3.bf16.msra.mxu1 %v1098_v28  ;;  %v789_v28 = vld [vmem:[#allocation16 + $0x4] ss:$0 sm:$0xff] }
 0x190   :  { %1103 = vmatprep.subr.bf16.mxu1 %v1102_v31 }
 0x193   :  { %1105 = vmatpush3.bf16.msra.mxu1 %v1102_v31 }
 0x194   :  { %1107 = vmatprep.subr.bf16.mxu1 %v1106_v34 }
 0x197   :  { %1109 = vmatpush3.bf16.msra.mxu1 %v1106_v34 }
 0x198   :  { %1111 = vmatprep.subr.bf16.mxu1 %v1110_v37 }
 0x19b   :  { %1113 = vmatpush3.bf16.msra.mxu1 %v1110_v37 }
 0x251   :  { %v912_v9 = vpop.f32.mrb[2].mxu1 }
 0x252   :  { %v425_v10 = vadd.f32 %v912_v9, %v786_v8  ;;  %v419_v11 = vpop.f32.mrb[3].mxu1 }
 0x253   :  { %v420_v12 = vadd.f32 %v786_v8, %v419_v11  ;;  %v663_v8 = vld [vmem:[#allocation14 + $0x68] sm:$0xff]  ;;  %v665_v11 = vld [vmem:[#allocation14 + $0x78] sm:$0xff] }
 0x254   :  { %v431_v13 = vmul.f32 0.70710677, %v425_v10  ;;  %v429_v20 = vmul.f32 0.5, %v425_v10  ;;  %v1138_v9 = vpack.c.bf16 %v663_v8, %v662_v7  ;;  %v664_v10 = vld [vmem:[#allocation14 + $0x70] sm:$0xff] }
 0x255   :  { %v430_v14 = vmul.f32 0.70710677, %v420_v12  ;;  %v428_v18 = vmul.f32 0.5, %v420_v12  ;;  %v1142_v12 = vpack.c.bf16 %v665_v11, %v664_v10 }
 0x256   :  { %1160 = verf.f32 %v431_v13  ;;  %v788_v13 = vld [vmem:[#allocation16 + $0x3] ss:$0 sm:$0xff] }
 0x257   :  { %1162 = verf.f32 %v430_v14 }
 0x260   :  { %v1161_v15 = vpop.eup %1160 }
 0x261   :  { %v1163_v16 = vpop.eup %1162  ;;  %v435_v17 = vadd.f32 1.0, %v1161_v15 }
 0x262   :  { %v434_v19 = vadd.f32 1.0, %v1163_v16 }
 0x263   :  { %v437_v22 = vmul.f32 %v435_v17, %v429_v20 }
 0x264   :  { %v436_v21 = vmul.f32 %v434_v19, %v428_v18 }
 0x266   :  { %945 = vmatprep.mubr.f32.mxu0 %v436_v21 }
 0x267   :  { %946 = vmatmul.mubr.f32.vlgmr.msra.gmra.mrb[2].mxu0 %v437_v22 }
 0x268   :  { %1117 = vmatpush3.bf16.msra.mxu0 %v1114_v41 }
 0x269   :  { %1119 = vmatprep.subr.bf16.mxu0 %v1118_v43 }
 0x26c   :  { %1121 = vmatpush3.bf16.msra.mxu0 %v1118_v43 }
 0x26d   :  { %1123 = vmatprep.subr.bf16.mxu0 %v1122_v46 }
 0x270   :  { %1125 = vmatpush3.bf16.msra.mxu0 %v1122_v46 }
 0x271   :  { %1127 = vmatprep.subr.bf16.mxu0 %v1126_v0 }
 0x274   :  { %1129 = vmatpush3.bf16.msra.mxu0 %v1126_v0 }
 0x275   :  { %1131 = vmatprep.subr.bf16.mxu0 %v1130_v3 }
 0x278   :  { %1133 = vmatpush3.bf16.msra.mxu0 %v1130_v3 }
 0x279   :  { %1135 = vmatprep.subr.bf16.mxu0 %v1134_v6 }
 0x27c   :  { %1137 = vmatpush3.bf16.msra.mxu0 %v1134_v6 }
 0x27d   :  { %1139 = vmatprep.subr.bf16.mxu0 %v1138_v9 }
 0x280   :  { %1141 = vmatpush3.bf16.msra.mxu0 %v1138_v9 }
 0x281   :  { %1143 = vmatprep.subr.bf16.mxu0 %v1142_v12 }
 0x284   :  { %1145 = vmatpush3.bf16.msra.mxu0 %v1142_v12 }
 0x33a   :  { %v947_v48 = vpop.f32.mrb[2].mxu0 }
 0x33b   :  { %v531_v49 = vadd.f32 %v947_v48, %v787_v47  ;;  %v525_v50 = vpop.f32.mrb[3].mxu0 }
 0x33c   :  { %v526_v51 = vadd.f32 %v787_v47, %v525_v50 }
 0x33d   :  { %v537_v52 = vmul.f32 0.70710677, %v531_v49  ;;  %v535_v59 = vmul.f32 0.5, %v531_v49 }
 0x33e   :  { %v536_v53 = vmul.f32 0.70710677, %v526_v51  ;;  %v534_v57 = vmul.f32 0.5, %v526_v51 }
 0x33f   :  { %1164 = verf.f32 %v537_v52 }
 0x340   :  { %1166 = verf.f32 %v536_v53 }
 0x349   :  { %v1165_v54 = vpop.eup %1164 }
 0x34a   :  { %v1167_v55 = vpop.eup %1166  ;;  %v541_v56 = vadd.f32 1.0, %v1165_v54 }
 0x34b   :  { %v540_v58 = vadd.f32 1.0, %v1167_v55 }
 0x34c   :  { %v543_v61 = vmul.f32 %v541_v56, %v535_v59 }
 0x34d   :  { %v542_v60 = vmul.f32 %v540_v58, %v534_v57 }
 0x34f   :  { %980 = vmatprep.mubr.f32.mxu1 %v542_v60 }
 0x350   :  { %981 = vmatmul.mubr.f32.vlgmr.msra.gmra.mrb[4].mxu1 %v543_v61 }
 0x423   :  { %v982_v14 = vpop.f32.mrb[4].mxu1 }
 0x424   :  { %v637_v15 = vadd.f32 %v982_v14, %v788_v13  ;;  %v631_v16 = vpop.f32.mrb[5].mxu1 }
 0x425   :  { %v632_v17 = vadd.f32 %v788_v13, %v631_v16 }
 0x426   :  { %v643_v18 = vmul.f32 0.70710677, %v637_v15  ;;  %v641_v25 = vmul.f32 0.5, %v637_v15 }
 0x427   :  { %v642_v19 = vmul.f32 0.70710677, %v632_v17  ;;  %v640_v23 = vmul.f32 0.5, %v632_v17 }
 0x428   :  { %1168 = verf.f32 %v643_v18 }
 0x429   :  { %1170 = verf.f32 %v642_v19 }
 0x432   :  { %v1169_v20 = vpop.eup %1168 }
 0x433   :  { %v1171_v21 = vpop.eup %1170  ;;  %v647_v22 = vadd.f32 1.0, %v1169_v20 }
 0x434   :  { %v646_v24 = vadd.f32 1.0, %v1171_v21 }
 0x435   :  { %v649_v27 = vmul.f32 %v647_v22, %v641_v25 }
 0x436   :  { %v648_v26 = vmul.f32 %v646_v24, %v640_v23 }
 0x438   :  { %1015 = vmatprep.mubr.f32.mxu0 %v648_v26 }
 0x439   :  { %1016 = vmatmul.mubr.f32.vlgmr.msra.gmra.mrb[4].mxu0 %v649_v27 }
 0x50c   :  { %v1017_v29 = vpop.f32.mrb[4].mxu0 }
 0x50d   :  { %v743_v30 = vadd.f32 %v1017_v29, %v789_v28  ;;  %v737_v31 = vpop.f32.mrb[5].mxu0 }
 0x50e   :  { %v738_v32 = vadd.f32 %v789_v28, %v737_v31 }
 0x50f   :  { %v749_v33 = vmul.f32 0.70710677, %v743_v30  ;;  %v747_v37 = vmul.f32 0.5, %v743_v30 }
 0x510   :  { %v748_v34 = vmul.f32 0.70710677, %v738_v32  ;;  %v746_v39 = vmul.f32 0.5, %v738_v32 }
 0x511   :  { %1172 = verf.f32 %v749_v33 }
 0x512   :  { %1174 = verf.f32 %v748_v34 }
 0x51b   :  { %v1173_v35 = vpop.eup %1172 }
 0x51c   :  { %v1175_v36 = vpop.eup %1174  ;;  %v753_v38 = vadd.f32 1.0, %v1173_v35 }
 0x51d   :  { %v752_v40 = vadd.f32 1.0, %v1175_v36 }
 0x51e   :  { %v755_v41 = vmul.f32 %v753_v38, %v747_v37 }
 0x51f   :  { %v754_v42 = vmul.f32 %v752_v40, %v746_v39 }
 0x520   :  { %757 = vst [vmem:[#allocation17 + $0x8] sm:$0xff] %v755_v41 }
 0x521   :  { %756 = vst [vmem:[#allocation17] sm:$0xff] %v754_v42 }
 0x522   :  { %1385 = shalt.err (!%p1382_p6)
}
 0x523   :  { %s1386_s17 = scalar_lea.hbm %s1638_s9, 256 }
 0x524   :  { %p1387_p7 = scmp.ne.s32.totalorder %s1638_s9, %s1386_s17  ;;  %p1390_p8 = scmp.lt.u32.totalorder %s1386_s17, %s1638_s9 }
 0x526   :  { %p1392_p9 = pnand %p1390_p8, %p1387_p7 }
 0x528   :  { %1395 = shalt.err (!%p1392_p9)
}
 0x529   :  { %769 = dma.vmem_to_hbm [thread:$0]  %s764_s27, 256, %s1638_s9, [#allocation4], %s1410_s21, %s1410_s21, %s1411_s22  }
 0x52a   :  { %1406 = dma.done.wait [#allocation4], 256  }
 0x52b   :  { %1407 = vsyncadd [#allocation4], 4294967040 }
 0x52c   :  { %773 = vsyncpa [#allocation3], 1 }
 0x52d   :  { %774 = vsyncpa [#allocation6], 1 }
 0x52e   :  { %775 = vsyncpa [#allocation9], 1 }
 0x52f   :  { %776 = vsyncpa [#allocation12], 1 }
 0x530   :  { %777 = vsyncpa [#allocation15], 1 }
 0x531   :  { %778 = vsyncpa [#allocation4], 1 }

</bundles_post_ra>
